<compile_context>
chip_gen: v7x
topology: tpu7x:2x2x1
jax: 0.10.0
libtpu: 0.0.40
codegen_flags: <defaults>
</compile_context>

<pallas_src>
import jax
import jax.numpy as jnp
from jax.experimental import pallas as pl
from jax.experimental.pallas import tpu as pltpu


def _round_up(n, m):
    return -(-n // m) * m


def _vmem_config():
    """(budget_bytes, vmem_limit_bytes) -- conservative defaults are v7x-safe
    (64 MiB VMEM/TC); raised on v5e/v6e (128 MiB) to pack bigger tiles."""
    budget, limit = 30 << 20, 48 << 20
    try:
        cap = int(pltpu.get_tpu_info().vmem_capacity_bytes)
        if cap >= (100 << 20):
            budget, limit = 80 << 20, 100 << 20
    except Exception:
        pass
    return budget, limit


def _pick_batch_block(B, C, N, itemsize, budget):
    """Largest divisor bb of B such that (a) there are >= 4 grid steps when B
    allows it (>= 2 steps per TensorCore on dual-core chips) and (b) one grid
    step's VMEM footprint fits the budget.  Returns (bb, fits)."""
    def footprint(bb):
        io = 2 * 2 * bb * C * N * itemsize              # double-buffered in + out tiles
        x_f32 = bb * C * N * 4 if itemsize < 4 else 0   # f32 upcast of x in epilogue (bf16 I/O)
        inter = bb * (3 * C * C * 4                     # energy, p, attention (f32)
                      + C * C * itemsize                # low-precision attention copy
                      + C * N * 4)                      # f32 second-matmul result
        return io + x_f32 + inter + (2 << 20)           # + Mosaic internal scratch slack

    min_steps = 4 if B >= 4 else B
    for bb in range(B, 0, -1):
        if B % bb or (B // bb) < min_steps:
            continue
        if footprint(bb) <= budget:
            return bb, True
    return 1, False


def _cam_fused(x_flat, gamma, *, bb, vmem_limit, use_bf16_matmul=False):
    """Whole (bb, C, N) tile per grid step; everything fused in one kernel."""
    B, C, N = x_flat.shape
    itemsize = x_flat.dtype.itemsize
    N_pad = _round_up(N, 128)
    if N_pad != N:
        # Zero columns are exact: they add 0 to every energy entry and to A @ X.
        x_in = jnp.pad(x_flat, ((0, 0), (0, 0), (0, N_pad - N)))
    else:
        x_in = x_flat

    mm_dtype = (jnp.bfloat16 if (use_bf16_matmul and x_flat.dtype == jnp.float32)
                else x_flat.dtype)

    def kernel(gamma_sref, x_ref, o_ref):
        x = x_ref[...]
        x_mm = x.astype(mm_dtype)
        # energy[b,i,j] = sum_n x[b,i,n] * x[b,j,n]  (no explicit X^T)
        energy = jnp.einsum("bcn,bkn->bck", x_mm, x_mm,
                            preferred_element_type=jnp.float32)        # (bb,C,C) f32
        # softmax(rowmax(E)-E) == softmax(-E); stable form needs one rowmin.
        e_min = jnp.min(energy, axis=-1, keepdims=True)
        p = jnp.exp(e_min - energy)
        attention = p / jnp.sum(p, axis=-1, keepdims=True)             # exact divide
        out = jnp.einsum("bck,bkn->bcn", attention.astype(mm_dtype), x_mm,
                         preferred_element_type=jnp.float32)           # (bb,C,N_pad) f32
        if N_pad != N:                                                 # write unpadded N
            out = out[:, :, :N]
            x = x[:, :, :N]
        o_ref[...] = (gamma_sref[0] * out + x).astype(o_ref.dtype)

    grid = (B // bb,)
    cost = pl.CostEstimate(flops=4 * B * C * C * N_pad,
                           transcendentals=B * C * C,
                           bytes_accessed=2 * B * C * N * itemsize)

    # TODO(synk): when B == 1 on dual-core chips one TensorCore idles; add an
    # N-parallel axis (share the small CxC attention) to use both cores.
    return pl.pallas_call(
        kernel,
        out_shape=jax.ShapeDtypeStruct((B, C, N), x_flat.dtype),
        grid_spec=pltpu.PrefetchScalarGridSpec(
            num_scalar_prefetch=1,                                     # gamma -> SMEM
            grid=grid,
            in_specs=[pl.BlockSpec((bb, C, N_pad), lambda b, g: (b, 0, 0))],
            out_specs=pl.BlockSpec((bb, C, N), lambda b, g: (b, 0, 0))),
        compiler_params=pltpu.CompilerParams(
            dimension_semantics=("parallel",),
            vmem_limit_bytes=vmem_limit),
        cost_estimate=cost,
    )(gamma, x_in)


def _cam_tiled(x_flat, gamma, *, budget, vmem_limit, tile_n=None):
    """N-tiled fallback for large C*N (v7x 64 MiB regime): two pallas_calls."""
    B, C, N = x_flat.shape
    itemsize = x_flat.dtype.itemsize
    N_pad = _round_up(N, 128)

    if tile_n is None:
        def step_bytes(tn):
            return (2 * 2 * C * tn * itemsize          # double-buffered x + out tiles
                    + 3 * C * C * 4                    # attention (db) + energy scratch
                    + 2 * C * tn * 4                   # f32 intermediates
                    + (2 << 20))
        tile_n = 128
        for cand in range(N_pad, 127, -128):
            if N_pad % cand == 0 and step_bytes(cand) <= budget:
                tile_n = cand
                break
    assert tile_n % 128 == 0 and N_pad % tile_n == 0
    n_tiles = N_pad // tile_n

    x_in = (jnp.pad(x_flat, ((0, 0), (0, 0), (0, N_pad - N)))
            if N_pad != N else x_flat)

    # ---- call A: (C, C) channel-attention matrix; energy accumulated over N tiles.
    def attn_kernel(x_ref, att_ref, eacc_ref):
        n = pl.program_id(1)

        @pl.when(n == 0)
        def _():
            eacc_ref[...] = jnp.zeros_like(eacc_ref)

        xt = x_ref[...]
        eacc_ref[...] += jnp.einsum("bcn,bkn->bck", xt, xt,
                                    preferred_element_type=jnp.float32)

        @pl.when(n == pl.num_programs(1) - 1)
        def _():
            e = eacc_ref[...]
            p = jnp.exp(jnp.min(e, axis=-1, keepdims=True) - e)
            att_ref[...] = p / jnp.sum(p, axis=-1, keepdims=True)

    att = pl.pallas_call(
        attn_kernel,
        out_shape=jax.ShapeDtypeStruct((B, C, C), jnp.float32),
        grid_spec=pltpu.PrefetchScalarGridSpec(
            num_scalar_prefetch=0,
            grid=(B, n_tiles),
            in_specs=[pl.BlockSpec((1, C, tile_n), lambda b, n: (b, 0, n))],
            out_specs=pl.BlockSpec((1, C, C), lambda b, n: (b, 0, 0)),
            scratch_shapes=[pltpu.VMEM((1, C, C), jnp.float32)]),
        compiler_params=pltpu.CompilerParams(
            dimension_semantics=("parallel", "arbitrary"),
            vmem_limit_bytes=vmem_limit),
        cost_estimate=pl.CostEstimate(
            flops=2 * B * C * C * N_pad, transcendentals=B * C * C,
            bytes_accessed=B * C * N_pad * itemsize + B * C * C * 4),
    )(x_in)

    # ---- call B: out tile = gamma * (A @ x_tile) + x_tile, fully parallel grid.
    def out_kernel(gamma_sref, att_ref, x_ref, o_ref):
        xt = x_ref[...]
        out = jnp.einsum("bck,bkn->bcn", att_ref[...].astype(xt.dtype), xt,
                         preferred_element_type=jnp.float32)
        o_ref[...] = (gamma_sref[0] * out + xt).astype(o_ref.dtype)

    out_flat = pl.pallas_call(
        out_kernel,
        out_shape=jax.ShapeDtypeStruct((B, C, N_pad), x_flat.dtype),
        grid_spec=pltpu.PrefetchScalarGridSpec(
            num_scalar_prefetch=1,                                     # gamma -> SMEM
            grid=(B, n_tiles),
            in_specs=[pl.BlockSpec((1, C, C), lambda b, n, g: (b, 0, 0)),
                      pl.BlockSpec((1, C, tile_n), lambda b, n, g: (b, 0, n))],
            out_specs=pl.BlockSpec((1, C, tile_n), lambda b, n, g: (b, 0, n))),
        compiler_params=pltpu.CompilerParams(
            dimension_semantics=("parallel", "parallel"),
            vmem_limit_bytes=vmem_limit),
        cost_estimate=pl.CostEstimate(
            flops=2 * B * C * C * N_pad, transcendentals=0,
            bytes_accessed=2 * B * C * N_pad * itemsize + B * C * C * 4),
    )(gamma, att, x_in)

    if N_pad != N:
        # TODO(synk): write the last tile at unpadded width to avoid this slice.
        out_flat = out_flat[:, :, :N]
    return out_flat


def cam_module_forward(x, gamma, *, force_tiled=False, tile_n=None,
                       use_bf16_matmul=False):
    """x: (B, C, H, W), gamma: (1,) -> (B, C, H, W).  Matches CAM_Module.forward."""
    B, C, H, W = x.shape
    N = H * W
    x_flat = x.reshape(B, C, N)
    budget, vmem_limit = _vmem_config()

    bb, fits = _pick_batch_block(B, C, _round_up(N, 128),
                                 x_flat.dtype.itemsize, budget)
    if force_tiled or not fits:
        out_flat = _cam_tiled(x_flat, gamma, budget=budget,
                              vmem_limit=vmem_limit, tile_n=tile_n)
    else:
        out_flat = _cam_fused(x_flat, gamma, bb=bb, vmem_limit=vmem_limit,
                              use_bf16_matmul=use_bf16_matmul)
    return out_flat.reshape(B, C, H, W)


def cam_reference(x, gamma):
    """Pure-JAX reference matching the PyTorch forward exactly."""
    B, C, H, W = x.shape
    q = x.reshape(B, C, -1).astype(jnp.float32)
    k = jnp.transpose(q, (0, 2, 1))
    energy = jnp.einsum("bcn,bnk->bck", q, k)
    energy_new = jnp.max(energy, axis=-1, keepdims=True) - energy
    att = jax.nn.softmax(energy_new, axis=-1)
    out = jnp.einsum("bck,bkn->bcn", att, q).reshape(B, C, H, W)
    return (gamma[0] * out + x.astype(jnp.float32)).astype(x.dtype)


if __name__ == "__main__":
    key = jax.random.PRNGKey(0)
    B, C, H, W = 2, 4, 16, 16
    x = jax.random.normal(key, (B, C, H, W), dtype=jnp.float32)

    gamma_init = jnp.zeros((1,), dtype=jnp.float32)      # nn.Parameter(torch.zeros(1))
    gamma_test = jnp.full((1,), 0.5, dtype=jnp.float32)  # exercises the attention path

    fwd = jax.jit(cam_module_forward)
    out0 = jax.block_until_ready(fwd(x, gamma_init))
    out1 = jax.block_until_ready(fwd(x, gamma_test))

    ref0 = cam_reference(x, gamma_init)
    ref1 = cam_reference(x, gamma_test)

    assert out0.shape == (B, C, H, W)
    # gamma = 0 path is a pure residual -> exact.
    assert jnp.allclose(out0, ref0, atol=1e-5, rtol=1e-5)
    # Attention path: tolerance leaves headroom for f32 MXU accumulation.
    assert jnp.allclose(out1, ref1, atol=5e-3, rtol=5e-3)

    # Also exercise the N-tiled fallback path (large C*N / v7x regime).
    out_tiled = jax.block_until_ready(
        cam_module_forward(x, gamma_test, force_tiled=True, tile_n=128))
    assert out_tiled.shape == (B, C, H, W)
    assert jnp.allclose(out_tiled, ref1, atol=5e-3, rtol=5e-3)

    print("KERNEL_OK")
</pallas_src>

<mosaic_0001>
module attributes {stable_mosaic.version = 11 : i64} {
  func.func @kernel(%arg0: i32, %arg1: memref<1xf32, #tpu.memory_space<smem>>, %arg2: memref<1x4x256xf32, #tpu.memory_space<vmem>>, %arg3: memref<1x4x256xf32, #tpu.memory_space<vmem>>) attributes {dimension_semantics = [#tpu.dimension_semantics<parallel>], iteration_bounds = array<i64: 2>, scalar_prefetch = 1 : i64, scratch_operands = 0 : i64, tpu.core_type = #tpu.core_type<tc>, window_params = [{transform_indices = @transform_0, window_bounds = array<i64: 1, 4, 256>}, {transform_indices = @transform_1, window_bounds = array<i64: 1, 4, 256>}]} {
    %c0 = arith.constant 0 : index
    %c0_0 = arith.constant 0 : index
    %c0_1 = arith.constant 0 : index
    %0 = vector.load %arg2[%c0, %c0_0, %c0_1] : memref<1x4x256xf32, #tpu.memory_space<vmem>>, vector<1x4x256xf32>
    "tpu.trace_start"() <{level = 10 : i32, message = "bcn,bkn->bck"}> : () -> ()
    %cst = arith.constant dense<0.000000e+00> : vector<1x4x4xf32>
    %1 = tpu.matmul %0, %0, %cst {dimension_numbers = #tpu.dot_dimension_numbers<[2], [2], [1], [1], [0, 0, 0, 1, 1, 1], [0], [0]>} : vector<1x4x256xf32>, vector<1x4x256xf32>, vector<1x4x4xf32> -> vector<1x4x4xf32>
    "tpu.trace_stop"() : () -> ()
    %cst_2 = arith.constant dense<0x7F800000> : vector<1x4xf32>
    %2 = vector.multi_reduction <minimumf>, %1, %cst_2 [2] : vector<1x4x4xf32> to vector<1x4xf32>
    %3 = vector.shape_cast %2 : vector<1x4xf32> to vector<1x4x1xf32>
    %4 = vector.broadcast %3 : vector<1x4x1xf32> to vector<1x4x4xf32>
    %5 = arith.subf %4, %1 : vector<1x4x4xf32>
    %6 = math.exp %5 : vector<1x4x4xf32>
    %cst_3 = arith.constant dense<0.000000e+00> : vector<1x4xf32>
    %7 = vector.multi_reduction <add>, %6, %cst_3 [2] : vector<1x4x4xf32> to vector<1x4xf32>
    %8 = vector.shape_cast %7 : vector<1x4xf32> to vector<1x4x1xf32>
    %9 = vector.broadcast %8 : vector<1x4x1xf32> to vector<1x4x4xf32>
    %10 = arith.divf %6, %9 : vector<1x4x4xf32>
    "tpu.trace_start"() <{level = 10 : i32, message = "bck,bkn->bcn"}> : () -> ()
    %cst_4 = arith.constant dense<0.000000e+00> : vector<1x4x256xf32>
    %11 = tpu.matmul %10, %0, %cst_4 {dimension_numbers = #tpu.dot_dimension_numbers<[2], [1], [1], [2], [0, 0, 0, 1, 1, 2], [0], [0]>} : vector<1x4x4xf32>, vector<1x4x256xf32>, vector<1x4x256xf32> -> vector<1x4x256xf32>
    "tpu.trace_stop"() : () -> ()
    %c0_5 = arith.constant 0 : index
    %12 = memref.load %arg1[%c0_5] : memref<1xf32, #tpu.memory_space<smem>>
    %13 = vector.broadcast %12 : f32 to vector<1x4x256xf32>
    %14 = arith.mulf %13, %11 : vector<1x4x256xf32>
    %15 = arith.addf %14, %0 : vector<1x4x256xf32>
    %c0_6 = arith.constant 0 : index
    %c0_7 = arith.constant 0 : index
    %c0_8 = arith.constant 0 : index
    %16 = vector.load %arg3[%c0_6, %c0_7, %c0_8] : memref<1x4x256xf32, #tpu.memory_space<vmem>>, vector<1x4x256xf32>
    tpu.vector_store %arg3[%c0_6, %c0_7, %c0_8], %15 {strides = array<i32>} : memref<1x4x256xf32, #tpu.memory_space<vmem>>, vector<1x4x256xf32>,
    return
  }
  func.func @transform_0(%arg0: i32, %arg1: memref<1xf32, #tpu.memory_space<smem>>) -> (i32, i32, i32) {
    %c0_i32 = arith.constant 0 : i32
    %c0_i32_0 = arith.constant 0 : i32
    %c0_i32_1 = arith.constant 0 : i32
    return %arg0, %c0_i32, %c0_i32_0 : i32, i32, i32
  }
  func.func @transform_1(%arg0: i32, %arg1: memref<1xf32, #tpu.memory_space<smem>>) -> (i32, i32, i32) {
    %c0_i32 = arith.constant 0 : i32
    %c0_i32_0 = arith.constant 0 : i32
    %c0_i32_1 = arith.constant 0 : i32
    return %arg0, %c0_i32, %c0_i32_0 : i32, i32, i32
  }
}

</mosaic_0001>

<bundles_post_ra>
// kernel: cam_module_forward.1
= control target key start
LH: loop header
LB: loop body
LE: loop exit
PB: predicated region body
PF: predicated region fallthrough
CT: control target
= control target key end

     0   :  { %s408_s11 = smov 0   ;;  %s432_s0 = inlined_call_operand.<no memory space> [shape: f32[1], index: 0, kind: input, shape index: {}]   ;;  %s433_s1 = inlined_call_operand.vmem [shape: f32[2,4,256], index: 1, kind: input, shape index: {}]   ;;  %s434_s2 = inlined_call_operand.vmem [shape: f32[2,4,256], index: 2, kind: output, shape index: {}]  }
   0x1   :  { %7 = sst [smem:[#allocation3]] %s432_s0 }
   0x2 LB: > { %s351_s12 = sadd.s32 4294967295, %s387_s11   ;;  %p355_p0 = scmp.ge.s32.totalorder %s387_s11, 1  ;;  %s387_s11 = sphi %s408_s11, %s13_s11  }
   0x3   : > { %p89_p1 = scmp.lt.s32.totalorder %s387_s11, 3 }
   0x5   : > { %p90_p2 = pnand %p355_p0, %p89_p1 }
   0x6   : > { %p109_p3 = scmp.lt.s32.totalorder (!%p90_p2), %s351_s12, 1  ;;  %vm193_vm0 = vcmask (!%p90_p2), 27648   ;;  %vm209_vm1 = vcmask (!%p90_p2), 1043456   ;;  %v389_v10 = vmov (!%p90_p2), 0.0   ;;  %vm205_vm2 = vcmask (!%p90_p2), 31744   ;;  %s285_s16 = sld [smem:[#allocation3]] (!%p90_p2) }
   0x7   : > { %93 = sbr.rel (%p90_p2) target bundleno = 770 (0x302), region = 24  ;;  %278 = vmatprep.mubr.f32.mxu1 (!%p90_p2), %v389_v10 }
   0xc   : > { %v286_v14 = vstv (!%p90_p2), %s285_s16 }
   0xe   : > { %s436_s12 = smov (!%p109_p3, %s351_s12), 1 }
   0xf   : > { %s365_s0 = sshll.u32 %s436_s12, 3 }
  0x10   : > { %s113_s15 = scalar_lea.vmem %s433_s1, %s365_s0  ;;  %s118_s19 = scalar_lea.vmem %s434_s2, %s365_s0 }
  0x11   : > { %v119_v0 = vld [vmem:[%s113_s15] sm:$0xff] }
  0x12   : > { %v121_v1 = vcombine.high %v119_v0, %v119_v0 }
  0x14   : > { %123 = vmatprep.subr.mxu0 %v121_v1  ;;  %187 = vmatprep.mubr.f32.mxu0 %v121_v1 }
  0x15   : > { %124 = vmatpush1.xpose.msra.mxu0 %v119_v0  ;;  %360 = vmatprep.subr.msk.mxu1 %vm209_vm1, %v121_v1 }
  0x16   : > { %361 = vmatpush1.msk.msra.mxu1 %vm209_vm1, %v119_v0 }
  0x18   : > { %188 = vmatmul.mubr.f32.vlgmr.msra.gmra.mrb[0].mxu0 %v119_v0 }
  0xeb   : > { %v189_v2 = vpop.f32.mrb[0].mxu0 }
  0xec   : > { %v191_v3 = vpop.f32.mrb[1].mxu0  ;;  %v194_v4 = vsel %vm193_vm0, %v189_v2, inf }
  0xed   : > { %195 = vmin.xlane.f32.xlu0 %v194_v4 }
 0x17a   : > { %v196_v5 = vpop.xlane.xlu0 %195 }
 0x17b   : > { %v197_v6 = vsub.f32 %v196_v5, %v189_v2 }
 0x17d   : > { %v198_v7 = vmul.f32 1.442695, %v197_v6 }
 0x17f   : > { %377 = vpow2.f32 %v198_v7 }
 0x189   : > { %v378_v8 = vpop.eup %377 }
 0x18a   : > { %v200_v9 = vsel %vm193_vm0, %v378_v8, 0.0 }
 0x18b   : > { %201 = vadd.xlane.f32.xlu0 %v200_v9 }
 0x218   : > { %v202_v11 = vpop.xlane.xlu0 %201 }
 0x219   : > { %379 = vrcp.f32 %v202_v11 }
 0x223   : > { %v380_v12 = vpop.eup %379 }
 0x224   : > { %v204_v13 = vmul.f32 %v380_v12, %v378_v8 }
 0x226   : > { %362 = vmatmul.mubr.msk.f32.vlgmr.msra.gmra.mrb[0].mxu1 %vm205_vm2, %v204_v13 }
 0x2f9   : > { %v280_v15 = vpop.f32.mrb[0].mxu1 }
 0x2fa   : > { %v287_v16 = vmul.f32 %v286_v14, %v280_v15  ;;  %v282_v17 = vpop.f32.mrb[1].mxu1 }
 0x2fb   : > { %v288_v18 = vmul.f32 %v286_v14, %v282_v17 }
 0x2fc   : > { %v289_v19 = vadd.f32 %v287_v16, %v119_v0 }
 0x2fd   : > { %v290_v20 = vadd.f32 %v288_v18, %v121_v1 }
 0x2ff   : > { %v293_v21 = vcombine.low %v289_v19, %v290_v20 }
 0x301   : > { %295 = vst [vmem:[%s118_s19] sm:$0xff] %v293_v21 }
 0x302 PF: > { %s13_s11 = sadd.s32 1, %s387_s11  }
 0x303   : > { %p10_p4 = scmp.ge.s32.totalorder %s13_s11, 4  }
 0x305   :  { %12 = sbr.rel (!%p10_p4) target bundleno = 2 (0x2), region = 54 }

</bundles_post_ra>
